<compile_context>
chip_gen: v7x
topology: tpu7x:2x2x1
jax: 0.10.0
libtpu: 0.0.40
codegen_flags: <defaults>
</compile_context>

<pallas_src>
import functools

import jax
import jax.numpy as jnp
from jax.experimental import pallas as pl
from jax.experimental.pallas import tpu as pltpu

BN_EPS = 1e-5
VMEM_LIMIT_BYTES = 32 * 1024 * 1024   # <= scoped VMEM on v5e/v6e/v7x


def _round_up(x, m):
    return (x + m - 1) // m * m


def _choose_tm(m_rows, k, d):
    """Row-tile size from the scoped-VMEM budget (double-buffered streams)."""
    budget = 24 * 1024 * 1024                       # headroom under the 32 MiB limit
    fixed = 2 * k * d * 4                           # resident W, double-buffered
    fixed += 6 * 2 * 8 * max(d, 128) * 4            # small (1,d)-ish buffers (padded)
    avail = max(budget - fixed, 1 << 20)
    per_row = 2 * (k + d) * 4                       # x-in + y-out blocks, 2 buffers, f32
    cap = max(128, min(2048, (avail // per_row) // 128 * 128))
    full = _round_up(m_rows, 8)
    return full if full <= cap else cap             # one full tile, or a 128-multiple


def _stats_kernel(x_ref, w_ref, sum_ref, sumsq_ref, *, m_rows, tm, need_mask):
    """Pass 1: per-feature sum / sum-of-squares of y = x @ W^T (bias dropped)."""
    i = pl.program_id(0)

    @pl.when(i == 0)
    def _init():
        sum_ref[...] = jnp.zeros_like(sum_ref)
        sumsq_ref[...] = jnp.zeros_like(sumsq_ref)

    y = jnp.dot(x_ref[...], w_ref[...], preferred_element_type=jnp.float32)
    if need_mask:
        # Ragged last row tile: rows >= M hold unspecified data -> zero them
        # before accumulating (cheap VALU work, hides under the DMA).
        row = jax.lax.broadcasted_iota(jnp.int32, (tm, 1), 0)
        y = jnp.where(i * tm + row < m_rows, y, 0.0)

    # Strip reductions over rows (VPU/XLU) instead of ones-vector MXU matmuls.
    sum_ref[...] += jnp.sum(y, axis=0, keepdims=True)
    sumsq_ref[...] += jnp.sum(y * y, axis=0, keepdims=True)


def _norm_kernel(x_ref, w_ref, sum_ref, sumsq_ref, gamma_ref, beta_ref, o_ref,
                 *, inv_m):
    """Pass 2: recompute y = x @ W^T and apply fused BN scale/shift + ReLU."""
    # Tiny (1, d) math: fold BN (training-mode batch stats) into scale/shift.
    # Recomputed per tile (negligible) so the grid axis can be "parallel"
    # without a cross-core prologue hazard.
    mean = sum_ref[...] * inv_m
    var = jnp.maximum(sumsq_ref[...] * inv_m - mean * mean, 0.0)
    scale = gamma_ref[...] * jax.lax.rsqrt(var + BN_EPS)
    shift = beta_ref[...] - mean * scale

    y = jnp.dot(x_ref[...], w_ref[...], preferred_element_type=jnp.float32)
    o_ref[...] = jnp.maximum(y * scale + shift, 0.0).astype(o_ref.dtype)


@jax.jit
def gin_layer(x, w_t, b, gamma, beta):
    """x: (B, N, K); w_t: (K, d); b/gamma/beta: (1, d). Returns (B, N, d) f32.

    Equivalent to Linear -> BatchNorm1d (training-mode batch stats) -> relu.
    The linear bias `b` cancels exactly under BN mean subtraction and is unused.
    """
    del b  # exactly cancelled by training-mode batch-mean subtraction
    B, N, K = x.shape
    d = w_t.shape[1]
    M = B * N

    x2d = x.reshape(M, K).astype(jnp.float32)       # no padding: reshape is free
    w32 = w_t.astype(jnp.float32)
    gamma32 = gamma.reshape(1, d).astype(jnp.float32)
    beta32 = beta.reshape(1, d).astype(jnp.float32)

    tm = _choose_tm(M, K, d)
    n_tiles = pl.cdiv(M, tm)
    need_mask = (M % tm) != 0

    # ---- Pass 1: batch statistics (reduction over the row-tile grid axis) ----
    feat_sum, feat_sumsq = pl.pallas_call(
        functools.partial(_stats_kernel, m_rows=M, tm=tm, need_mask=need_mask),
        out_shape=(
            jax.ShapeDtypeStruct((1, d), jnp.float32),
            jax.ShapeDtypeStruct((1, d), jnp.float32),
        ),
        grid=(n_tiles,),
        in_specs=[
            pl.BlockSpec((tm, K), lambda i: (i, 0)),   # x row tile (unpadded K)
            pl.BlockSpec((K, d), lambda i: (0, 0)),    # W^T (resident)
        ],
        out_specs=(
            pl.BlockSpec((1, d), lambda i: (0, 0)),    # resident accumulator
            pl.BlockSpec((1, d), lambda i: (0, 0)),    # resident accumulator
        ),
        compiler_params=pltpu.CompilerParams(
            dimension_semantics=("arbitrary",),
            vmem_limit_bytes=VMEM_LIMIT_BYTES,
        ),
    )(x2d, w32)

    # ---- Pass 2: normalize (independent tiles -> parallel / megacore) ----
    out2d = pl.pallas_call(
        functools.partial(_norm_kernel, inv_m=1.0 / M),
        out_shape=jax.ShapeDtypeStruct((M, d), jnp.float32),
        grid=(n_tiles,),
        in_specs=[
            pl.BlockSpec((tm, K), lambda i: (i, 0)),   # x row tile
            pl.BlockSpec((K, d), lambda i: (0, 0)),    # W^T (resident)
            pl.BlockSpec((1, d), lambda i: (0, 0)),    # feature sums
            pl.BlockSpec((1, d), lambda i: (0, 0)),    # feature sums of squares
            pl.BlockSpec((1, d), lambda i: (0, 0)),    # gamma
            pl.BlockSpec((1, d), lambda i: (0, 0)),    # beta
        ],
        out_specs=pl.BlockSpec((tm, d), lambda i: (i, 0)),
        compiler_params=pltpu.CompilerParams(
            dimension_semantics=("parallel",),
            vmem_limit_bytes=VMEM_LIMIT_BYTES,
        ),
    )(x2d, w32, feat_sum, feat_sumsq, gamma32, beta32)

    return out2d.reshape(B, N, d)                     # free metadata op (no slice)


def init_params(key, input_dim, output_dim):
    kw, kb = jax.random.split(key)
    # xavier_normal_ on nn.Linear.weight (shape (out, in)): std = sqrt(2/(fan_in+fan_out))
    std = (2.0 / (input_dim + output_dim)) ** 0.5
    w = std * jax.random.normal(kw, (output_dim, input_dim), jnp.float32)
    # nn.Linear default bias init: U(-1/sqrt(fan_in), 1/sqrt(fan_in))
    bound = 1.0 / (input_dim ** 0.5)
    b = jax.random.uniform(kb, (1, output_dim), jnp.float32, -bound, bound)
    # BatchNorm1d affine params: weight=1, bias=0
    gamma = jnp.ones((1, output_dim), jnp.float32)
    beta = jnp.zeros((1, output_dim), jnp.float32)
    # pre-transpose weight to (K, d) for the kernel
    return w.T, b, gamma, beta


if __name__ == "__main__":
    B, N, input_dim, output_dim = 2, 8, 32, 32

    key = jax.random.PRNGKey(0)
    kx, kp = jax.random.split(key)
    x = jax.random.normal(kx, (B, N, input_dim), jnp.float32)
    w_t, b, gamma, beta = init_params(kp, input_dim, output_dim)

    out = gin_layer(x, w_t, b, gamma, beta)
    jax.block_until_ready(out)

    # Pure-JAX reference (Linear with bias -> BN train-mode -> relu); verifies
    # that folding the bias out of the kernel is exact.
    y = x.reshape(B * N, input_dim) @ w_t + b
    m = y.mean(0, keepdims=True)
    v = ((y - m) ** 2).mean(0, keepdims=True)
    ref = jnp.maximum((y - m) / jnp.sqrt(v + BN_EPS) * gamma + beta, 0.0)
    ref = ref.reshape(B, N, output_dim)
    assert jnp.allclose(out, ref, atol=1e-5, rtol=1e-5)

    print("KERNEL_OK")
</pallas_src>

<mosaic_0001>
module attributes {stable_mosaic.version = 11 : i64} {
  func.func @_norm_kernel(%arg0: i32, %arg1: memref<16x32xf32, #tpu.memory_space<vmem>>, %arg2: memref<32x32xf32, #tpu.memory_space<vmem>>, %arg3: memref<1x32xf32, #tpu.memory_space<vmem>>, %arg4: memref<1x32xf32, #tpu.memory_space<vmem>>, %arg5: memref<1x32xf32, #tpu.memory_space<vmem>>, %arg6: memref<1x32xf32, #tpu.memory_space<vmem>>, %arg7: memref<16x32xf32, #tpu.memory_space<vmem>>) attributes {dimension_semantics = [#tpu.dimension_semantics<parallel>], iteration_bounds = array<i64: 1>, scalar_prefetch = 0 : i64, scratch_operands = 0 : i64, tpu.core_type = #tpu.core_type<tc>, window_params = [{transform_indices = @transform_0, window_bounds = array<i64: 16, 32>}, {pipeline_mode = #tpu.pipeline_mode<synchronous>, transform_indices = @transform_1, window_bounds = array<i64: 32, 32>}, {pipeline_mode = #tpu.pipeline_mode<synchronous>, transform_indices = @transform_2, window_bounds = array<i64: 1, 32>}, {pipeline_mode = #tpu.pipeline_mode<synchronous>, transform_indices = @transform_3, window_bounds = array<i64: 1, 32>}, {pipeline_mode = #tpu.pipeline_mode<synchronous>, transform_indices = @transform_4, window_bounds = array<i64: 1, 32>}, {pipeline_mode = #tpu.pipeline_mode<synchronous>, transform_indices = @transform_5, window_bounds = array<i64: 1, 32>}, {transform_indices = @transform_6, window_bounds = array<i64: 16, 32>}]} {
    %c0 = arith.constant 0 : index
    %c0_0 = arith.constant 0 : index
    %0 = vector.load %arg3[%c0, %c0_0] : memref<1x32xf32, #tpu.memory_space<vmem>>, vector<1x32xf32>
    %cst = arith.constant 6.250000e-02 : f32
    %1 = vector.broadcast %cst : f32 to vector<1x32xf32>
    %2 = arith.mulf %0, %1 : vector<1x32xf32>
    %c0_1 = arith.constant 0 : index
    %c0_2 = arith.constant 0 : index
    %3 = vector.load %arg4[%c0_1, %c0_2] : memref<1x32xf32, #tpu.memory_space<vmem>>, vector<1x32xf32>
    %cst_3 = arith.constant 6.250000e-02 : f32
    %4 = vector.broadcast %cst_3 : f32 to vector<1x32xf32>
    %5 = arith.mulf %3, %4 : vector<1x32xf32>
    %6 = arith.mulf %2, %2 : vector<1x32xf32>
    %7 = arith.subf %5, %6 : vector<1x32xf32>
    %cst_4 = arith.constant 0.000000e+00 : f32
    %8 = vector.broadcast %cst_4 : f32 to vector<1x32xf32>
    %9 = arith.maximumf %7, %8 : vector<1x32xf32>
    %c0_5 = arith.constant 0 : index
    %c0_6 = arith.constant 0 : index
    %10 = vector.load %arg5[%c0_5, %c0_6] : memref<1x32xf32, #tpu.memory_space<vmem>>, vector<1x32xf32>
    %cst_7 = arith.constant 9.99999974E-6 : f32
    %11 = vector.broadcast %cst_7 : f32 to vector<1x32xf32>
    %12 = arith.addf %9, %11 : vector<1x32xf32>
    %13 = math.rsqrt %12 : vector<1x32xf32>
    %14 = arith.mulf %10, %13 : vector<1x32xf32>
    %c0_8 = arith.constant 0 : index
    %c0_9 = arith.constant 0 : index
    %15 = vector.load %arg6[%c0_8, %c0_9] : memref<1x32xf32, #tpu.memory_space<vmem>>, vector<1x32xf32>
    %16 = arith.mulf %2, %14 : vector<1x32xf32>
    %17 = arith.subf %15, %16 : vector<1x32xf32>
    %c0_10 = arith.constant 0 : index
    %c0_11 = arith.constant 0 : index
    %18 = vector.load %arg1[%c0_10, %c0_11] : memref<16x32xf32, #tpu.memory_space<vmem>>, vector<16x32xf32>
    %c0_12 = arith.constant 0 : index
    %c0_13 = arith.constant 0 : index
    %19 = vector.load %arg2[%c0_12, %c0_13] : memref<32x32xf32, #tpu.memory_space<vmem>>, vector<32x32xf32>
    %cst_14 = arith.constant dense<0.000000e+00> : vector<16x32xf32>
    %20 = tpu.matmul %18, %19, %cst_14 {dimension_numbers = #tpu.dot_dimension_numbers<[1], [0], [0], [1], [0, 0, 1, 1], [], []>} : vector<16x32xf32>, vector<32x32xf32>, vector<16x32xf32> -> vector<16x32xf32>
    %21 = vector.broadcast %14 : vector<1x32xf32> to vector<16x32xf32>
    %22 = arith.mulf %20, %21 : vector<16x32xf32>
    %23 = vector.broadcast %17 : vector<1x32xf32> to vector<16x32xf32>
    %24 = arith.addf %22, %23 : vector<16x32xf32>
    %cst_15 = arith.constant 0.000000e+00 : f32
    %25 = vector.broadcast %cst_15 : f32 to vector<16x32xf32>
    %26 = arith.maximumf %24, %25 : vector<16x32xf32>
    %c0_16 = arith.constant 0 : index
    %c0_17 = arith.constant 0 : index
    %27 = vector.load %arg7[%c0_16, %c0_17] : memref<16x32xf32, #tpu.memory_space<vmem>>, vector<16x32xf32>
    tpu.vector_store %arg7[%c0_16, %c0_17], %26 {strides = array<i32>} : memref<16x32xf32, #tpu.memory_space<vmem>>, vector<16x32xf32>,
    return
  }
  func.func @transform_0(%arg0: i32) -> (i32, i32) {
    %c0_i32 = arith.constant 0 : i32
    %c0_i32_0 = arith.constant 0 : i32
    return %arg0, %c0_i32 : i32, i32
  }
  func.func @transform_1(%arg0: i32) -> (i32, i32) {
    %c0_i32 = arith.constant 0 : i32
    %c0_i32_0 = arith.constant 0 : i32
    %c0_i32_1 = arith.constant 0 : i32
    return %c0_i32, %c0_i32_0 : i32, i32
  }
  func.func @transform_2(%arg0: i32) -> (i32, i32) {
    %c0_i32 = arith.constant 0 : i32
    %c0_i32_0 = arith.constant 0 : i32
    %c0_i32_1 = arith.constant 0 : i32
    return %c0_i32, %c0_i32_0 : i32, i32
  }
  func.func @transform_3(%arg0: i32) -> (i32, i32) {
    %c0_i32 = arith.constant 0 : i32
    %c0_i32_0 = arith.constant 0 : i32
    %c0_i32_1 = arith.constant 0 : i32
    return %c0_i32, %c0_i32_0 : i32, i32
  }
  func.func @transform_4(%arg0: i32) -> (i32, i32) {
    %c0_i32 = arith.constant 0 : i32
    %c0_i32_0 = arith.constant 0 : i32
    %c0_i32_1 = arith.constant 0 : i32
    return %c0_i32, %c0_i32_0 : i32, i32
  }
  func.func @transform_5(%arg0: i32) -> (i32, i32) {
    %c0_i32 = arith.constant 0 : i32
    %c0_i32_0 = arith.constant 0 : i32
    %c0_i32_1 = arith.constant 0 : i32
    return %c0_i32, %c0_i32_0 : i32, i32
  }
  func.func @transform_6(%arg0: i32) -> (i32, i32) {
    %c0_i32 = arith.constant 0 : i32
    %c0_i32_0 = arith.constant 0 : i32
    return %arg0, %c0_i32 : i32, i32
  }
}

module attributes {stable_mosaic.version = 11 : i64} {
  func.func @_stats_kernel(%arg0: i32, %arg1: memref<16x32xf32, #tpu.memory_space<vmem>>, %arg2: memref<32x32xf32, #tpu.memory_space<vmem>>, %arg3: memref<1x32xf32, #tpu.memory_space<vmem>>, %arg4: memref<1x32xf32, #tpu.memory_space<vmem>>) attributes {dimension_semantics = [#tpu.dimension_semantics<arbitrary>], iteration_bounds = array<i64: 1>, scalar_prefetch = 0 : i64, scratch_operands = 0 : i64, tpu.core_type = #tpu.core_type<tc>, window_params = [{transform_indices = @transform_0, window_bounds = array<i64: 16, 32>}, {pipeline_mode = #tpu.pipeline_mode<synchronous>, transform_indices = @transform_1, window_bounds = array<i64: 32, 32>}, {pipeline_mode = #tpu.pipeline_mode<synchronous>, transform_indices = @transform_2, window_bounds = array<i64: 1, 32>}, {pipeline_mode = #tpu.pipeline_mode<synchronous>, transform_indices = @transform_3, window_bounds = array<i64: 1, 32>}]} {
    %c0_i32 = arith.constant 0 : i32
    %0 = arith.cmpi eq, %arg0, %c0_i32 : i32
    %1 = arith.extui %0 : i1 to i32
    %c0_i32_0 = arith.constant 0 : i32
    %2 = arith.cmpi ne, %1, %c0_i32_0 : i32
    scf.if %2 {
      %cst_14 = arith.constant 0.000000e+00 : f32
      %17 = vector.broadcast %cst_14 : f32 to vector<1x32xf32>
      %c0_15 = arith.constant 0 : index
      %c0_16 = arith.constant 0 : index
      %18 = vector.load %arg3[%c0_15, %c0_16] : memref<1x32xf32, #tpu.memory_space<vmem>>, vector<1x32xf32>
      tpu.vector_store %arg3[%c0_15, %c0_16], %17 {strides = array<i32>} : memref<1x32xf32, #tpu.memory_space<vmem>>, vector<1x32xf32>,
      %cst_17 = arith.constant 0.000000e+00 : f32
      %19 = vector.broadcast %cst_17 : f32 to vector<1x32xf32>
      %c0_18 = arith.constant 0 : index
      %c0_19 = arith.constant 0 : index
      %20 = vector.load %arg4[%c0_18, %c0_19] : memref<1x32xf32, #tpu.memory_space<vmem>>, vector<1x32xf32>
      tpu.vector_store %arg4[%c0_18, %c0_19], %19 {strides = array<i32>} : memref<1x32xf32, #tpu.memory_space<vmem>>, vector<1x32xf32>,
    } else {
    }
    %c0 = arith.constant 0 : index
    %c0_1 = arith.constant 0 : index
    %3 = vector.load %arg1[%c0, %c0_1] : memref<16x32xf32, #tpu.memory_space<vmem>>, vector<16x32xf32>
    %c0_2 = arith.constant 0 : index
    %c0_3 = arith.constant 0 : index
    %4 = vector.load %arg2[%c0_2, %c0_3] : memref<32x32xf32, #tpu.memory_space<vmem>>, vector<32x32xf32>
    %cst = arith.constant dense<0.000000e+00> : vector<16x32xf32>
    %5 = tpu.matmul %3, %4, %cst {dimension_numbers = #tpu.dot_dimension_numbers<[1], [0], [0], [1], [0, 0, 1, 1], [], []>} : vector<16x32xf32>, vector<32x32xf32>, vector<16x32xf32> -> vector<16x32xf32>
    %c0_4 = arith.constant 0 : index
    %c0_5 = arith.constant 0 : index
    %6 = vector.load %arg3[%c0_4, %c0_5] : memref<1x32xf32, #tpu.memory_space<vmem>>, vector<1x32xf32>
    %cst_6 = arith.constant dense<0.000000e+00> : vector<32xf32>
    %7 = vector.multi_reduction <add>, %5, %cst_6 [0] : vector<16x32xf32> to vector<32xf32>
    %8 = vector.shape_cast %7 : vector<32xf32> to vector<1x32xf32>
    %9 = arith.addf %6, %8 : vector<1x32xf32>
    %c0_7 = arith.constant 0 : index
    %c0_8 = arith.constant 0 : index
    %10 = vector.load %arg3[%c0_7, %c0_8] : memref<1x32xf32, #tpu.memory_space<vmem>>, vector<1x32xf32>
    tpu.vector_store %arg3[%c0_7, %c0_8], %9 {strides = array<i32>} : memref<1x32xf32, #tpu.memory_space<vmem>>, vector<1x32xf32>,
    %c0_9 = arith.constant 0 : index
    %c0_10 = arith.constant 0 : index
    %11 = vector.load %arg4[%c0_9, %c0_10] : memref<1x32xf32, #tpu.memory_space<vmem>>, vector<1x32xf32>
    %12 = arith.mulf %5, %5 : vector<16x32xf32>
    %cst_11 = arith.constant dense<0.000000e+00> : vector<32xf32>
    %13 = vector.multi_reduction <add>, %12, %cst_11 [0] : vector<16x32xf32> to vector<32xf32>
    %14 = vector.shape_cast %13 : vector<32xf32> to vector<1x32xf32>
    %15 = arith.addf %11, %14 : vector<1x32xf32>
    %c0_12 = arith.constant 0 : index
    %c0_13 = arith.constant 0 : index
    %16 = vector.load %arg4[%c0_12, %c0_13] : memref<1x32xf32, #tpu.memory_space<vmem>>, vector<1x32xf32>
    tpu.vector_store %arg4[%c0_12, %c0_13], %15 {strides = array<i32>} : memref<1x32xf32, #tpu.memory_space<vmem>>, vector<1x32xf32>,
    return
  }
  func.func @transform_0(%arg0: i32) -> (i32, i32) {
    %c0_i32 = arith.constant 0 : i32
    %c0_i32_0 = arith.constant 0 : i32
    return %arg0, %c0_i32 : i32, i32
  }
  func.func @transform_1(%arg0: i32) -> (i32, i32) {
    %c0_i32 = arith.constant 0 : i32
    %c0_i32_0 = arith.constant 0 : i32
    %c0_i32_1 = arith.constant 0 : i32
    return %c0_i32, %c0_i32_0 : i32, i32
  }
  func.func @transform_2(%arg0: i32) -> (i32, i32) {
    %c0_i32 = arith.constant 0 : i32
    %c0_i32_0 = arith.constant 0 : i32
    %c0_i32_1 = arith.constant 0 : i32
    return %c0_i32, %c0_i32_0 : i32, i32
  }
  func.func @transform_3(%arg0: i32) -> (i32, i32) {
    %c0_i32 = arith.constant 0 : i32
    %c0_i32_0 = arith.constant 0 : i32
    %c0_i32_1 = arith.constant 0 : i32
    return %c0_i32, %c0_i32_0 : i32, i32
  }
}

</mosaic_0001>

<bundles_post_ra>
// kernel: gin_layer.2
= control target key start
LH: loop header
LB: loop body
LE: loop exit
PB: predicated region body
PF: predicated region fallthrough
CT: control target
= control target key end

     0   :  { %9 = vsyncpa [#allocation3], 0  ;;  %s330_s0 = inlined_call_operand.hbm [shape: f32[16,32], index: 0, kind: input, shape index: {}]   ;;  %s331_s1 = inlined_call_operand.hbm [shape: f32[32,32], index: 1, kind: input, shape index: {}]   ;;  %s332_s2 = inlined_call_operand.vmem [shape: f32[1,32], index: 2, kind: output, shape index: {0}]   ;;  %s333_s3 = inlined_call_operand.vmem [shape: f32[1,32], index: 3, kind: output, shape index: {1}]  }
   0x1   :  { %10 = vsyncpa [#allocation5], 0  ;;  %s253_s12 = smov [#allocation2]   ;;  %s205_s16 = scalar_lea.hbm %s330_s0, 256 }
   0x2   :  { %s16_s13 = sshll.u32 %s253_s12, 4  ;;  %p206_p0 = scmp.ne.s32.totalorder %s330_s0, %s205_s16  ;;  %s17_s13 = int_to_ptr.vmem [resolvable:$true] %s16_s13 }
   0x3   :  { %p209_p1 = scmp.lt.u32.totalorder %s205_s16, %s330_s0 }
   0x5   :  { %p211_p2 = pnand %p209_p1, %p206_p0 }
   0x7   :  { %214 = shalt.err (!%p211_p2)
}
   0x8   :  { %s215_s21 = scalar_lea.vmem %s17_s13, 256  ;;  %p220_p4 = scmp.lt.s32.totalorder %s17_s13, %s17_s13 }
   0x9   :  { %p216_p3 = scmp.ne.s32.totalorder %s17_s13, %s215_s21  ;;  %p221_p5 = scmp.lt.s32.totalorder %s215_s21, %s215_s21 }
   0xb   :  { %p222_p6 = por %p221_p5, %p220_p4 }
   0xd   :  { %p223_p7 = pnand %p222_p6, %p216_p3 }
   0xf   :  { %226 = shalt.err (!%p223_p7)
}
  0x10   :  { %s254_s22 = smov 128   ;;  %s255_s23 = smov 8  }
  0x11   :  { %22 = dma.hbm_to_vmem [thread:$0]  %s330_s0, 256, %s17_s13, [#allocation3], %s254_s22, %s254_s22, %s255_s23  }
  0x12   :  { %s256_s26 = smov [#allocation4]   ;;  %s227_s30 = scalar_lea.hbm %s331_s1, 512 }
  0x13   :  { %s28_s27 = sshll.u32 %s256_s26, 4  ;;  %p228_p8 = scmp.ne.s32.totalorder %s331_s1, %s227_s30  ;;  %s29_s27 = int_to_ptr.vmem [resolvable:$true] %s28_s27 }
  0x14   :  { %p231_p9 = scmp.lt.u32.totalorder %s227_s30, %s331_s1 }
  0x16   :  { %p233_p10 = pnand %p231_p9, %p228_p8 }
  0x18   :  { %236 = shalt.err (!%p233_p10)
}
  0x19   :  { %s237_s8 = scalar_lea.vmem %s29_s27, 512  ;;  %p242_p12 = scmp.lt.s32.totalorder %s29_s27, %s29_s27 }
  0x1a   :  { %p238_p11 = scmp.ne.s32.totalorder %s29_s27, %s237_s8  ;;  %p243_p13 = scmp.lt.s32.totalorder %s237_s8, %s237_s8 }
  0x1c   :  { %p244_p0 = por %p243_p13, %p242_p12 }
  0x1e   :  { %p245_p1 = pnand %p244_p0, %p238_p11 }
  0x20   :  { %248 = shalt.err (!%p245_p1)
}
  0x21   :  { %34 = dma.hbm_to_vmem [thread:$0]  %s331_s1, 512, %s29_s27, [#allocation5], %s254_s22, %s254_s22, %s255_s23  }
  0x22   :  { %249 = dma.done.wait [#allocation3], 256  }
  0x23   :  { %250 = vsyncadd [#allocation3], 4294967040 }
  0x24   :  { %251 = dma.done.wait [#allocation5], 512  }
  0x25   :  { %252 = vsyncadd [#allocation5], 4294966784  ;;  %vm54_vm0 = vcmask 261120   ;;  %v50_v0 = vld [vmem:[#allocation4] sm:$0xff]  ;;  %v51_v1 = vld [vmem:[#allocation4 + $0x8] sm:$0xff]  ;;  %vm45_vm1 = vcmask 253952  }
  0x26   :  { %v52_v2 = vld [vmem:[#allocation4 + $0x10] sm:$0xff]  ;;  %v192_v3 = vpack.c.bf16 %v51_v1, %v50_v0  ;;  %v53_v4 = vld [vmem:[#allocation4 + $0x18] sm:$0xff]  ;;  %v257_v8 = vmov 0.0  }
  0x27   :  { %v48_v5 = vld [vmem:[#allocation2] sm:$0xff]  ;;  %v196_v6 = vpack.c.bf16 %v53_v4, %v52_v2  ;;  %v49_v7 = vld [vmem:[#allocation2 + $0x8] sm:$0xff]  ;;  %46 = vst.msk [vmem:[%s332_s2] sm:$0x1] %vm45_vm1, %v257_v8  ;;  %47 = vst.msk [vmem:[%s333_s3] sm:$0x1] %vm45_vm1, %v257_v8 }
  0x28   :  { %189 = vmatprep.mubr.msk.f32.mxu0 %vm54_vm0, %v48_v5  ;;  %193 = vmatprep.subr.bf16.mxu0 %v192_v3 }
  0x29   :  { %195 = vmatpush3.bf16.msra.mxu0 %v192_v3 }
  0x2a   :  { %197 = vmatprep.subr.bf16.mxu0 %v196_v6 }
  0x2d   :  { %199 = vmatpush3.bf16.msra.mxu0 %v196_v6 }
  0x2e   :  { %v136_v28 = vld [vmem:[%s332_s2] sm:$0x1] }
  0x2f   :  { %v149_v31 = vld [vmem:[%s333_s3] sm:$0x1] }
  0x30   :  { %190 = vmatmul.mubr.msk.f32.vlgmr.msra.gmra.mrb[0].mxu0 %vm54_vm0, %v49_v7 }
 0x103   :  { %v191_v9 = vpop.f32.mrb[0].mxu0 }
 0x104   :  { %v138_v10 = vsel %vm54_vm0, %v191_v9, 0.0  ;;  %v151_v11 = vmul.f32 %v191_v9, %v191_v9  ;;  %v127_v12 = vpop.f32.mrb[1].mxu0 }
 0x105   :  { %v137_v13 = vsel %vm54_vm0, %v127_v12, 0.0  ;;  %v150_v14 = vmul.f32 %v127_v12, %v127_v12 }
 0x106   :  { %v153_v15 = vsel %vm54_vm0, %v151_v11, 0.0  ;;  %v139_v16 = vadd.f32 %v138_v10, %v137_v13 }
 0x107   :  { %v152_v17 = vsel %vm54_vm0, %v150_v14, 0.0 }
 0x108   :  { %v140_v18 = vrot.slane %v139_v16, 4  ;;  %v154_v19 = vadd.f32 %v153_v15, %v152_v17 }
 0x10a   :  { %v141_v20 = vadd.f32 %v140_v18, %v139_v16  ;;  %v155_v21 = vrot.slane %v154_v19, 4 }
 0x10c   :  { %v142_v22 = vrot.slane %v141_v20, 2  ;;  %v156_v23 = vadd.f32 %v155_v21, %v154_v19 }
 0x10e   :  { %v143_v24 = vadd.f32 %v142_v22, %v141_v20  ;;  %v157_v25 = vrot.slane %v156_v23, 2 }
 0x110   :  { %v144_v26 = vrot.slane %v143_v24, 1  ;;  %v158_v27 = vadd.f32 %v157_v25, %v156_v23 }
 0x112   :  { %v145_v29 = vadd.f32 %v144_v26, %v143_v24  ;;  %v159_v30 = vrot.slane %v158_v27, 1 }
 0x114   :  { %v146_v32 = vadd.f32 %v145_v29, %v136_v28  ;;  %v160_v33 = vadd.f32 %v159_v30, %v158_v27 }
 0x116   :  { %148 = vst.msk [vmem:[%s332_s2] sm:$0x1] %vm45_vm1, %v146_v32  ;;  %v161_v34 = vadd.f32 %v160_v33, %v149_v31 }
 0x118   :  { %162 = vst.msk [vmem:[%s333_s3] sm:$0x1] %vm45_vm1, %v161_v34 }
 0x119   :  { %171 = vsyncpa [#allocation3], 1 }
 0x11a   :  { %172 = vsyncpa [#allocation5], 1 }

// kernel: gin_layer.3
= control target key start
LH: loop header
LB: loop body
LE: loop exit
PB: predicated region body
PF: predicated region fallthrough
CT: control target
= control target key end

     0   :  { %vm44_vm0 = vcmask 261120   ;;  %s302_s0 = inlined_call_operand.vmem [shape: f32[16,32], index: 0, kind: input, shape index: {}]   ;;  %s303_s1 = inlined_call_operand.vmem [shape: f32[32,32], index: 1, kind: input, shape index: {}]   ;;  %s304_s2 = inlined_call_operand.vmem [shape: f32[1,32], index: 2, kind: input, shape index: {}]   ;;  %s305_s3 = inlined_call_operand.vmem [shape: f32[1,32], index: 3, kind: input, shape index: {}]   ;;  %s306_s4 = inlined_call_operand.vmem [shape: f32[1,32], index: 4, kind: input, shape index: {}]   ;;  %s307_s5 = inlined_call_operand.vmem [shape: f32[1,32], index: 5, kind: input, shape index: {}]   ;;  %s308_s6 = inlined_call_operand.hbm [shape: f32[16,32], index: 6, kind: output, shape index: {}]  }
   0x1   :  { %v40_v0 = vld [vmem:[%s303_s1] sm:$0xff]  ;;  %v41_v1 = vld [vmem:[%s303_s1 + $0x8] sm:$0xff]  ;;  %v42_v2 = vld [vmem:[%s303_s1 + $0x10] sm:$0xff] }
   0x2   :  { %v181_v3 = vpack.c.bf16 %v41_v1, %v40_v0  ;;  %v43_v4 = vld [vmem:[%s303_s1 + $0x18] sm:$0xff]  ;;  %v38_v5 = vld [vmem:[%s302_s0] sm:$0xff] }
   0x3   :  { %v185_v6 = vpack.c.bf16 %v43_v4, %v42_v2  ;;  %178 = vmatprep.mubr.msk.f32.mxu0 %vm44_vm0, %v38_v5 }
   0x4   :  { %182 = vmatprep.subr.bf16.mxu0 %v181_v3 }
   0x5   :  { %11 = vsyncpa [#allocation3], 0  ;;  %184 = vmatpush3.bf16.msra.mxu0 %v181_v3  ;;  %v39_v7 = vld [vmem:[%s302_s0 + $0x8] sm:$0xff]  ;;  %v24_v8 = vld [vmem:[%s304_s2] sm:$0x1]  ;;  %v127_v18 = vlaneseq }
   0x6   :  { %186 = vmatprep.subr.bf16.mxu0 %v185_v6  ;;  %v25_v9 = vmul.f32 0.0625, %v24_v8  ;;  %v26_v10 = vld [vmem:[%s305_s3] sm:$0x1]  ;;  %s218_s3 = smov [#allocation2]  }
   0x7   :  { %v27_v11 = vmul.f32 0.0625, %v26_v10  ;;  %v31_v17 = vld [vmem:[%s306_s4] sm:$0x1]  ;;  %v128_v20 = vshrl.u32 %v127_v18, 7  ;;  %s151_s14 = sshll.u32 %s218_s3, 4  ;;  %s152_s14 = int_to_ptr.vmem [resolvable:$true] %s151_s14 }
   0x8   :  { %v28_v12 = vmul.f32 %v25_v9, %v25_v9  ;;  %v35_v22 = vld [vmem:[%s307_s5] sm:$0x1]  ;;  %s194_s4 = scalar_lea.vmem %s152_s14, 256  ;;  %p199_p1 = scmp.lt.s32.totalorder %s152_s14, %s152_s14 }
   0x9   :  { %188 = vmatpush3.bf16.msra.mxu0 %v185_v6  ;;  %v129_v23 = vsub.s32 0, %v128_v20  ;;  %p195_p0 = scmp.ne.s32.totalorder %s152_s14, %s194_s4  ;;  %p200_p2 = scmp.lt.s32.totalorder %s194_s4, %s194_s4 }
   0xa   :  { %v29_v13 = vsub.f32 %v27_v11, %v28_v12 }
   0xb   :  { %p201_p3 = por %p200_p2, %p199_p1 }
   0xc   :  { %179 = vmatmul.mubr.msk.f32.vlgmr.msra.gmra.mrb[0].mxu0 %vm44_vm0, %v39_v7  ;;  %v30_v14 = vmax.f32 %v29_v13, 0.0 }
   0xd   :  { %p202_p4 = pnand %p201_p3, %p195_p0 }
   0xe   :  { %v32_v15 = vadd.f32 1e-05, %v30_v14 }
  0x10   :  { %192 = vrsqrt.f32 %v32_v15 }
  0x1a   :  { %v193_v16 = vpop.eup %192 }
  0x1b   :  { %v34_v19 = vmul.f32 %v193_v16, %v31_v17 }
  0x1d   :  { %v36_v21 = vmul.f32 %v34_v19, %v25_v9  ;;  %v130_v25 = vrot.slane %v34_v19, %v129_v23 }
  0x1f   :  { %v37_v24 = vsub.f32 %v35_v22, %v36_v21 }
  0x21   :  { %v138_v26 = vrot.slane %v37_v24, %v129_v23 }
  0xdf   :  { %v180_v27 = vpop.f32.mrb[0].mxu0 }
  0xe0   :  { %v133_v28 = vmul.f32 %v180_v27, %v130_v25  ;;  %v117_v29 = vpop.f32.mrb[1].mxu0 }
  0xe1   :  { %v132_v30 = vmul.f32 %v130_v25, %v117_v29 }
  0xe2   :  { %v141_v31 = vadd.f32 %v138_v26, %v133_v28 }
  0xe3   :  { %v140_v32 = vadd.f32 %v138_v26, %v132_v30 }
  0xe4   :  { %v143_v33 = vmax.f32 %v141_v31, 0.0 }
  0xe5   :  { %v142_v34 = vmax.f32 %v140_v32, 0.0 }
  0xe6   :  { %145 = vst.msk [vmem:[#allocation2 + $0x8] sm:$0xff] %vm44_vm0, %v143_v33 }
  0xe7   :  { %144 = vst.msk [vmem:[#allocation2] sm:$0xff] %vm44_vm0, %v142_v34 }
  0xe8   :  { %205 = shalt.err (!%p202_p4)
}
  0xe9   :  { %s206_s16 = scalar_lea.hbm %s308_s6, 256 }
  0xea   :  { %p207_p5 = scmp.ne.s32.totalorder %s308_s6, %s206_s16  ;;  %p210_p6 = scmp.lt.u32.totalorder %s206_s16, %s308_s6 }
  0xec   :  { %p212_p7 = pnand %p210_p6, %p207_p5 }
  0xee   :  { %215 = shalt.err (!%p212_p7)
}
  0xef   :  { %s219_s21 = smov 128   ;;  %s220_s22 = smov 8  }
  0xf0   :  { %157 = dma.vmem_to_hbm [thread:$0]  %s152_s14, 256, %s308_s6, [#allocation3], %s219_s21, %s219_s21, %s220_s22  }
  0xf1   :  { %216 = dma.done.wait [#allocation3], 256  }
  0xf2   :  { %217 = vsyncadd [#allocation3], 4294967040 }
  0xf3   :  { %161 = vsyncpa [#allocation3], 1 }

</bundles_post_ra>
